<compile_context>
chip_gen: v7x
topology: tpu7x:2x2x1
jax: 0.10.0
libtpu: 0.0.40
codegen_flags: <defaults>
</compile_context>

<pallas_src>
import jax
import jax.numpy as jnp
from jax import lax
from jax.experimental import pallas as pl
from jax.experimental.pallas import tpu as pltpu

_LANE = 128
_NEG_FILL = float(jnp.finfo(jnp.float32).min)


def _round_up(x, m):
    return -(-x // m) * m


def _make_kernel(*, S, s_tile, b_blk, n_s):
    inv_S = 1.0 / float(S)
    n_lb = s_tile // _LANE
    ragged = (S % s_tile) != 0
    last_start = (n_s - 1) * s_tile

    def _accumulate(x, sum_ref, max_ref, *, masked):
        # Combine every 128-lane slab of the tile with VPU add/max; keep the
        # (b_blk, C, 128) lane-resident partials and do ONE ref RMW at the end.
        p_sum = None
        p_max = None
        for j in range(n_lb):
            lo = j * _LANE
            if masked:
                g_lo = last_start + lo
                if g_lo >= S:
                    continue                       # slab fully out of bounds
                blk = x[:, :, lo:lo + _LANE].astype(jnp.float32)
                n_valid = S - g_lo
                if n_valid < _LANE:                # the single boundary slab
                    col = lax.broadcasted_iota(jnp.int32, (1, 1, _LANE), 2)
                    valid = col < n_valid
                    blk_s = jnp.where(valid, blk, 0.0)
                    blk_m = jnp.where(valid, blk, _NEG_FILL)
                else:
                    blk_s = blk
                    blk_m = blk
            else:
                blk = x[:, :, lo:lo + _LANE].astype(jnp.float32)
                blk_s = blk
                blk_m = blk
            p_sum = blk_s if p_sum is None else p_sum + blk_s
            p_max = blk_m if p_max is None else jnp.maximum(p_max, blk_m)
        sum_ref[...] += p_sum
        max_ref[...] = jnp.maximum(max_ref[...], p_max)

    def kernel(x_ref, w1t_ref, w2t_ref, o_ref, sum_ref, max_ref):
        s = pl.program_id(1)

        @pl.when(s == 0)
        def _init():
            sum_ref[...] = jnp.zeros(sum_ref.shape, jnp.float32)
            max_ref[...] = jnp.full(max_ref.shape, _NEG_FILL, jnp.float32)

        x = x_ref[...]                                  # (b_blk, C, s_tile)

        if ragged:
            # Fast (unmasked) path for every tile except the last one.
            @pl.when(s < n_s - 1)
            def _fast():
                _accumulate(x, sum_ref, max_ref, masked=False)

            # Masked path only on the final, ragged spatial tile.
            @pl.when(s == n_s - 1)
            def _tail():
                _accumulate(x, sum_ref, max_ref, masked=True)
        else:
            _accumulate(x, sum_ref, max_ref, masked=False)

        @pl.when(s == n_s - 1)
        def _epilogue():
            # Single cross-lane reduction + relayout, once per batch block.
            avg_p = jnp.sum(sum_ref[...], axis=-1) * inv_S    # (b_blk, C)
            max_p = jnp.max(max_ref[...], axis=-1)            # (b_blk, C)
            w1t = w1t_ref[...]                                 # (C, hidden) f32
            w2t = w2t_ref[...]                                 # (hidden, C) f32
            # fc2 is linear (bias-free), so
            #   fc2(relu(fc1(avg))) + fc2(relu(fc1(max)))
            #     == fc2( relu(fc1(avg)) + relu(fc1(max)) )
            h_avg = jnp.maximum(
                jnp.dot(avg_p, w1t, preferred_element_type=jnp.float32), 0.0)
            h_max = jnp.maximum(
                jnp.dot(max_p, w1t, preferred_element_type=jnp.float32), 0.0)
            att = jnp.dot(h_avg + h_max, w2t,
                          preferred_element_type=jnp.float32)  # (b_blk, C)
            sig = 1.0 / (1.0 + jnp.exp(-att))
            o_ref[...] = sig[None].astype(o_ref.dtype)         # (1, b_blk, C)

    return kernel


def channel_attention(x, w1, w2, *, s_tile=None, b_blk=None, budget_bytes=None):
    """CBAM ChannelAttention forward.

    x : [B, C, H, W] (NCHW)
    w1: [C // ratio, C]   -- fc1 1x1-conv weight (squeezed from [out, in, 1, 1])
    w2: [C, C // ratio]   -- fc2 1x1-conv weight (squeezed)
    Returns sigmoid channel attention of shape [B, C, 1, 1].
    """
    B, C, H, W = x.shape
    hidden = w1.shape[0]
    S = H * W

    x_flat = x.reshape(B, C, S)
    # Pre-transpose + pre-upcast the tiny weights in the wrapper (done once,
    # never re-executed per batch block inside the kernel).
    w1t = jnp.transpose(w1).astype(jnp.float32)        # (C, hidden)
    w2t = jnp.transpose(w2).astype(jnp.float32)        # (hidden, C)

    itemsize = jnp.dtype(x.dtype).itemsize
    if budget_bytes is None:
        # ~4 MiB per streamed x buffer: double-buffered ~8 MiB fits v5e's
        # 16 MiB scoped default; raise for large S on v6e/v7x if desired.
        budget_bytes = 4 * 1024 * 1024

    if b_blk is None:
        # Keep >= 2 batch blocks when B > 1 so the "parallel" grid axis can be
        # sharded across v7x's two TensorCores (no-op on v5e/v6e).
        b_blk = min(8, pl.cdiv(B, 2)) if B > 1 else 1
        # TODO(synk): for B == 1 a parallel spatial-superchunk axis (partial
        # pooled outputs + tiny combine op) would keep both v7x cores busy.
    b_blk = max(1, min(int(b_blk), B))
    # Large-C guard: shrink the batch block before flooring s_tile at 128.
    while b_blk > 1 and b_blk * C * _LANE * itemsize > budget_bytes:
        b_blk = max(1, b_blk // 2)

    if s_tile is None:
        s_tile = (budget_bytes // max(1, b_blk * C * itemsize)) // _LANE * _LANE
        s_tile = max(_LANE, s_tile)
    s_tile = int(_round_up(int(s_tile), _LANE))
    s_tile = min(s_tile, int(_round_up(S, _LANE)))

    n_b = pl.cdiv(B, b_blk)
    n_s = pl.cdiv(S, s_tile)
    grid = (n_b, n_s)

    kernel = _make_kernel(S=S, s_tile=s_tile, b_blk=b_blk, n_s=n_s)

    # Scoped-VMEM limit derived from the actual block / scratch sizes
    # (double-buffered inputs/outputs + resident weights + f32 accumulators).
    x_block = b_blk * C * s_tile * itemsize
    w_bytes = (C * hidden + hidden * C) * 4
    out_block = b_blk * C * itemsize
    scratch = 2 * b_blk * C * _LANE * 4
    vmem_need = 2 * x_block + 2 * w_bytes + 2 * out_block + scratch
    vmem_limit = int(min(max(vmem_need * 3 // 2 + (2 << 20), 16 << 20), 64 << 20))

    cost = pl.CostEstimate(
        flops=int(2 * B * C * S + 6 * B * C * hidden),
        transcendentals=int(B * C),
        bytes_accessed=int(x_flat.size * itemsize
                           + (w1t.size + w2t.size) * 4
                           + B * C * itemsize),
    )

    out = pl.pallas_call(
        kernel,
        out_shape=jax.ShapeDtypeStruct((n_b, b_blk, C), x.dtype),
        grid_spec=pltpu.PrefetchScalarGridSpec(
            num_scalar_prefetch=0,
            grid=grid,
            in_specs=[
                # Streamed input, tiled over (batch block, spatial tile).
                pl.BlockSpec((b_blk, C, s_tile), lambda b, s: (b, 0, s)),
                # Tiny weights: constant block index -> resident in VMEM.
                pl.BlockSpec((C, hidden), lambda b, s: (0, 0)),
                pl.BlockSpec((hidden, C), lambda b, s: (0, 0)),
            ],
            out_specs=pl.BlockSpec((1, b_blk, C), lambda b, s: (b, 0, 0)),
            scratch_shapes=[
                pltpu.VMEM((b_blk, C, _LANE), jnp.float32),   # running sum
                pltpu.VMEM((b_blk, C, _LANE), jnp.float32),   # running max
            ],
        ),
        compiler_params=pltpu.CompilerParams(
            dimension_semantics=("parallel", "arbitrary"),
            vmem_limit_bytes=vmem_limit,
        ),
        cost_estimate=cost,
    )(x_flat, w1t, w2t)

    out = out.reshape(n_b * b_blk, C)[:B]
    return out.reshape(B, C, 1, 1)


def _reference(x, w1, w2):
    xf = x.astype(jnp.float32)
    avg_p = jnp.mean(xf, axis=(2, 3))
    max_p = jnp.max(xf, axis=(2, 3))
    w1f = w1.astype(jnp.float32)
    w2f = w2.astype(jnp.float32)

    def mlp(p):
        h = jnp.maximum(p @ w1f.T, 0.0)
        return h @ w2f.T

    return jax.nn.sigmoid(mlp(avg_p) + mlp(max_p))[:, :, None, None].astype(x.dtype)


if __name__ == "__main__":
    key = jax.random.PRNGKey(0)
    kx1, kx2, kx3, k1, k2 = jax.random.split(key, 5)

    ratio = 16
    B, C = 2, 64
    hidden = C // ratio  # 4

    # Deterministic Conv2d(1x1, bias=False) weights, squeezed to [out, in].
    bound1 = 1.0 / jnp.sqrt(jnp.float32(C))
    bound2 = 1.0 / jnp.sqrt(jnp.float32(hidden))
    w1 = jax.random.uniform(k1, (hidden, C), jnp.float32, -bound1, bound1)
    w2 = jax.random.uniform(k2, (C, hidden), jnp.float32, -bound2, bound2)

    # Case 1: spatial extent divisible by the tile -> multi-step accumulation,
    # pure unmasked fast path.
    x1 = jax.random.normal(kx1, (B, C, 16, 16), dtype=jnp.float32)
    out1 = channel_attention(x1, w1, w2, s_tile=128)
    jax.block_until_ready(out1)
    ref1 = _reference(x1, w1, w2)
    assert out1.shape == (B, C, 1, 1)
    assert jnp.allclose(out1, ref1, atol=2e-5, rtol=2e-5), \
        float(jnp.max(jnp.abs(out1 - ref1)))

    # Case 2: ragged spatial tail (144 = 128 + 16) -> masked path on the last
    # tile only (single boundary slab).
    x2 = jax.random.normal(kx2, (B, C, 12, 12), dtype=jnp.float32)
    out2 = channel_attention(x2, w1, w2, s_tile=128)
    jax.block_until_ready(out2)
    ref2 = _reference(x2, w1, w2)
    assert out2.shape == (B, C, 1, 1)
    assert jnp.allclose(out2, ref2, atol=2e-5, rtol=2e-5), \
        float(jnp.max(jnp.abs(out2 - ref2)))

    # Case 3: odd batch (partial batch block), S < 128, auto tiling heuristic.
    x3 = jax.random.normal(kx3, (5, C, 10, 10), dtype=jnp.float32)
    out3 = channel_attention(x3, w1, w2)
    jax.block_until_ready(out3)
    ref3 = _reference(x3, w1, w2)
    assert out3.shape == (5, C, 1, 1)
    assert jnp.allclose(out3, ref3, atol=2e-5, rtol=2e-5), \
        float(jnp.max(jnp.abs(out3 - ref3)))

    print("KERNEL_OK")
</pallas_src>

<mosaic_0001>
module attributes {stable_mosaic.version = 11 : i64} {
  func.func @kernel(%arg0: i32, %arg1: i32, %arg2: memref<1x64x128xf32, #tpu.memory_space<vmem>>, %arg3: memref<64x4xf32, #tpu.memory_space<vmem>>, %arg4: memref<4x64xf32, #tpu.memory_space<vmem>>, %arg5: memref<1x1x64xf32, #tpu.memory_space<vmem>>, %arg6: memref<1x64x128xf32, #tpu.memory_space<vmem>>, %arg7: memref<1x64x128xf32, #tpu.memory_space<vmem>>) attributes {dimension_semantics = [#tpu.dimension_semantics<parallel>, #tpu.dimension_semantics<arbitrary>], iteration_bounds = array<i64: 2, 2>, scalar_prefetch = 0 : i64, scratch_operands = 2 : i64, tpu.core_type = #tpu.core_type<tc>, window_params = [{transform_indices = @transform_0, window_bounds = array<i64: 1, 64, 128>}, {pipeline_mode = #tpu.pipeline_mode<synchronous>, transform_indices = @transform_1, window_bounds = array<i64: 64, 4>}, {pipeline_mode = #tpu.pipeline_mode<synchronous>, transform_indices = @transform_2, window_bounds = array<i64: 4, 64>}, {transform_indices = @transform_3, window_bounds = array<i64: 1, 1, 64>}]} {
    %c0_i32 = arith.constant 0 : i32
    %0 = arith.cmpi eq, %arg1, %c0_i32 : i32
    %1 = arith.extui %0 : i1 to i32
    %c0_i32_0 = arith.constant 0 : i32
    %2 = arith.cmpi ne, %1, %c0_i32_0 : i32
    scf.if %2 {
      %cst = arith.constant 0.000000e+00 : f32
      %13 = vector.broadcast %cst : f32 to vector<1x64x128xf32>
      %c0_16 = arith.constant 0 : index
      %c0_17 = arith.constant 0 : index
      %c0_18 = arith.constant 0 : index
      %14 = vector.load %arg6[%c0_16, %c0_17, %c0_18] : memref<1x64x128xf32, #tpu.memory_space<vmem>>, vector<1x64x128xf32>
      tpu.vector_store %arg6[%c0_16, %c0_17, %c0_18], %13 {strides = array<i32>} : memref<1x64x128xf32, #tpu.memory_space<vmem>>, vector<1x64x128xf32>,
      %cst_19 = arith.constant -3.40282347E+38 : f32
      %15 = vector.broadcast %cst_19 : f32 to vector<1x64x128xf32>
      %c0_20 = arith.constant 0 : index
      %c0_21 = arith.constant 0 : index
      %c0_22 = arith.constant 0 : index
      %16 = vector.load %arg7[%c0_20, %c0_21, %c0_22] : memref<1x64x128xf32, #tpu.memory_space<vmem>>, vector<1x64x128xf32>
      tpu.vector_store %arg7[%c0_20, %c0_21, %c0_22], %15 {strides = array<i32>} : memref<1x64x128xf32, #tpu.memory_space<vmem>>, vector<1x64x128xf32>,
    } else {
    }
    %c0 = arith.constant 0 : index
    %c0_1 = arith.constant 0 : index
    %c0_2 = arith.constant 0 : index
    %3 = vector.load %arg2[%c0, %c0_1, %c0_2] : memref<1x64x128xf32, #tpu.memory_space<vmem>>, vector<1x64x128xf32>
    %c0_3 = arith.constant 0 : index
    %c0_4 = arith.constant 0 : index
    %c0_5 = arith.constant 0 : index
    %4 = vector.load %arg6[%c0_3, %c0_4, %c0_5] : memref<1x64x128xf32, #tpu.memory_space<vmem>>, vector<1x64x128xf32>
    %5 = arith.addf %4, %3 : vector<1x64x128xf32>
    %c0_6 = arith.constant 0 : index
    %c0_7 = arith.constant 0 : index
    %c0_8 = arith.constant 0 : index
    %6 = vector.load %arg6[%c0_6, %c0_7, %c0_8] : memref<1x64x128xf32, #tpu.memory_space<vmem>>, vector<1x64x128xf32>
    tpu.vector_store %arg6[%c0_6, %c0_7, %c0_8], %5 {strides = array<i32>} : memref<1x64x128xf32, #tpu.memory_space<vmem>>, vector<1x64x128xf32>,
    %c0_9 = arith.constant 0 : index
    %c0_10 = arith.constant 0 : index
    %c0_11 = arith.constant 0 : index
    %7 = vector.load %arg7[%c0_9, %c0_10, %c0_11] : memref<1x64x128xf32, #tpu.memory_space<vmem>>, vector<1x64x128xf32>
    %8 = arith.maximumf %7, %3 : vector<1x64x128xf32>
    %c0_12 = arith.constant 0 : index
    %c0_13 = arith.constant 0 : index
    %c0_14 = arith.constant 0 : index
    %9 = vector.load %arg7[%c0_12, %c0_13, %c0_14] : memref<1x64x128xf32, #tpu.memory_space<vmem>>, vector<1x64x128xf32>
    tpu.vector_store %arg7[%c0_12, %c0_13, %c0_14], %8 {strides = array<i32>} : memref<1x64x128xf32, #tpu.memory_space<vmem>>, vector<1x64x128xf32>,
    %c1_i32 = arith.constant 1 : i32
    %10 = arith.cmpi eq, %arg1, %c1_i32 : i32
    %11 = arith.extui %10 : i1 to i32
    %c0_i32_15 = arith.constant 0 : i32
    %12 = arith.cmpi ne, %11, %c0_i32_15 : i32
    scf.if %12 {
      %c0_16 = arith.constant 0 : index
      %c0_17 = arith.constant 0 : index
      %c0_18 = arith.constant 0 : index
      %13 = vector.load %arg6[%c0_16, %c0_17, %c0_18] : memref<1x64x128xf32, #tpu.memory_space<vmem>>, vector<1x64x128xf32>
      %cst = arith.constant dense<0.000000e+00> : vector<1x64xf32>
      %14 = vector.multi_reduction <add>, %13, %cst [2] : vector<1x64x128xf32> to vector<1x64xf32>
      %cst_19 = arith.constant 3.906250e-03 : f32
      %15 = vector.broadcast %cst_19 : f32 to vector<1x64xf32>
      %16 = arith.mulf %14, %15 : vector<1x64xf32>
      %c0_20 = arith.constant 0 : index
      %c0_21 = arith.constant 0 : index
      %c0_22 = arith.constant 0 : index
      %17 = vector.load %arg7[%c0_20, %c0_21, %c0_22] : memref<1x64x128xf32, #tpu.memory_space<vmem>>, vector<1x64x128xf32>
      %cst_23 = arith.constant dense<0xFF800000> : vector<1x64xf32>
      %18 = vector.multi_reduction <maximumf>, %17, %cst_23 [2] : vector<1x64x128xf32> to vector<1x64xf32>
      %c0_24 = arith.constant 0 : index
      %c0_25 = arith.constant 0 : index
      %19 = vector.load %arg3[%c0_24, %c0_25] : memref<64x4xf32, #tpu.memory_space<vmem>>, vector<64x4xf32>
      %c0_26 = arith.constant 0 : index
      %c0_27 = arith.constant 0 : index
      %20 = vector.load %arg4[%c0_26, %c0_27] : memref<4x64xf32, #tpu.memory_space<vmem>>, vector<4x64xf32>
      %cst_28 = arith.constant dense<0.000000e+00> : vector<1x4xf32>
      %21 = tpu.matmul %16, %19, %cst_28 {dimension_numbers = #tpu.dot_dimension_numbers<[1], [0], [0], [1], [0, 0, 1, 1], [], []>} : vector<1x64xf32>, vector<64x4xf32>, vector<1x4xf32> -> vector<1x4xf32>
      %cst_29 = arith.constant 0.000000e+00 : f32
      %22 = vector.broadcast %cst_29 : f32 to vector<1x4xf32>
      %23 = arith.maximumf %21, %22 : vector<1x4xf32>
      %cst_30 = arith.constant dense<0.000000e+00> : vector<1x4xf32>
      %24 = tpu.matmul %18, %19, %cst_30 {dimension_numbers = #tpu.dot_dimension_numbers<[1], [0], [0], [1], [0, 0, 1, 1], [], []>} : vector<1x64xf32>, vector<64x4xf32>, vector<1x4xf32> -> vector<1x4xf32>
      %cst_31 = arith.constant 0.000000e+00 : f32
      %25 = vector.broadcast %cst_31 : f32 to vector<1x4xf32>
      %26 = arith.maximumf %24, %25 : vector<1x4xf32>
      %27 = arith.addf %23, %26 : vector<1x4xf32>
      %cst_32 = arith.constant dense<0.000000e+00> : vector<1x64xf32>
      %28 = tpu.matmul %27, %20, %cst_32 {dimension_numbers = #tpu.dot_dimension_numbers<[1], [0], [0], [1], [0, 0, 1, 1], [], []>} : vector<1x4xf32>, vector<4x64xf32>, vector<1x64xf32> -> vector<1x64xf32>
      %cst_33 = arith.constant 0.000000e+00 : f32
      %29 = vector.broadcast %cst_33 : f32 to vector<1x64xf32>
      %30 = arith.subf %29, %28 : vector<1x64xf32>
      %31 = math.exp %30 : vector<1x64xf32>
      %cst_34 = arith.constant 1.000000e+00 : f32
      %32 = vector.broadcast %cst_34 : f32 to vector<1x64xf32>
      %33 = arith.addf %32, %31 : vector<1x64xf32>
      %cst_35 = arith.constant 1.000000e+00 : f32
      %34 = vector.broadcast %cst_35 : f32 to vector<1x64xf32>
      %35 = arith.divf %34, %33 : vector<1x64xf32>
      %36 = vector.shape_cast %35 : vector<1x64xf32> to vector<1x1x64xf32>
      %c0_36 = arith.constant 0 : index
      %c0_37 = arith.constant 0 : index
      %c0_38 = arith.constant 0 : index
      %37 = vector.load %arg5[%c0_36, %c0_37, %c0_38] : memref<1x1x64xf32, #tpu.memory_space<vmem>>, vector<1x1x64xf32>
      tpu.vector_store %arg5[%c0_36, %c0_37, %c0_38], %36 {strides = array<i32>} : memref<1x1x64xf32, #tpu.memory_space<vmem>>, vector<1x1x64xf32>,
    } else {
    }
    return
  }
  func.func @transform_0(%arg0: i32, %arg1: i32) -> (i32, i32, i32) {
    %c0_i32 = arith.constant 0 : i32
    %c0_i32_0 = arith.constant 0 : i32
    return %arg0, %c0_i32, %arg1 : i32, i32, i32
  }
  func.func @transform_1(%arg0: i32, %arg1: i32) -> (i32, i32) {
    %c0_i32 = arith.constant 0 : i32
    %c0_i32_0 = arith.constant 0 : i32
    %c0_i32_1 = arith.constant 0 : i32
    return %c0_i32, %c0_i32_0 : i32, i32
  }
  func.func @transform_2(%arg0: i32, %arg1: i32) -> (i32, i32) {
    %c0_i32 = arith.constant 0 : i32
    %c0_i32_0 = arith.constant 0 : i32
    %c0_i32_1 = arith.constant 0 : i32
    return %c0_i32, %c0_i32_0 : i32, i32
  }
  func.func @transform_3(%arg0: i32, %arg1: i32) -> (i32, i32, i32) {
    %c0_i32 = arith.constant 0 : i32
    %c0_i32_0 = arith.constant 0 : i32
    %c0_i32_1 = arith.constant 0 : i32
    return %arg0, %c0_i32, %c0_i32_0 : i32, i32, i32
  }
}

</mosaic_0001>

<bundles_post_ra>
// kernel: tpu_custom_call.1
= control target key start
LH: loop header
LB: loop body
LE: loop exit
PB: predicated region body
PF: predicated region fallthrough
CT: control target
= control target key end

     0   :  { %8 = vsyncpa [#allocation5], 0  ;;  %s1466_s0 = inlined_call_operand.hbm [shape: f32[2,64,256], index: 0, kind: input, shape index: {}]   ;;  %s1467_s1 = inlined_call_operand.vmem [shape: f32[64,4], index: 1, kind: input, shape index: {}]   ;;  %s1468_s2 = inlined_call_operand.vmem [shape: f32[4,64], index: 2, kind: input, shape index: {}]   ;;  %s1469_s3 = inlined_call_operand.hbm [shape: f32[2,1,64], index: 3, kind: output, shape index: {}]  }
   0x1   :  { %10 = vsyncpa [#allocation5 + $0x1], 0 }
   0x2   :  { %11 = vsyncpa [#allocation6], 0 }
   0x3   :  { %13 = vsyncpa [#allocation6 + $0x1], 0  ;;  %s1187_s12 = smov 0   ;;  %s1189_s13 = smov 0  }
   0x4   :  { %s1191_s14 = smov 0   ;;  %s1193_s15 = smov 0  }
   0x5   :  { %s1195_s16 = smov 0   ;;  %s1197_s17 = smov 0  }
   0x6   :  { %s1199_s18 = smov 0   ;;  %s1201_s19 = smov 0  }
   0x7   :  { %s1203_s20 = smov 0   ;;  %s1205_s21 = smov 0  }
   0x8   :  { %s1207_s22 = smov 0  }
   0x9 LB: > { %s784_s23 = sadd.s32 4294967295, %s1155_s22   ;;  %s785_s24 = sadd.s32 4294967294, %s1155_s22   ;;  %s1155_s22 = sphi %s1207_s22, %s19_s22   ;;  %s1151_s21 = sphi %s1205_s21, %s1493_s21   ;;  %s1147_s20 = sphi %s1203_s20, %s1492_s20   ;;  %s1143_s19 = sphi %s1201_s19, %s1491_s19   ;;  %s1139_s18 = sphi %s1199_s18, %s1490_s18   ;;  %s1135_s17 = sphi %s1197_s17, %s1489_s17   ;;  %s1131_s16 = sphi %s1195_s16, %s1488_s16   ;;  %s1127_s15 = sphi %s1193_s15, %s1487_s15   ;;  %s1123_s14 = sphi %s1191_s14, %s1486_s14   ;;  %s1119_s13 = sphi %s1189_s13, %s1485_s13   ;;  %s1115_s12 = sphi %s1187_s12, %s1484_s12  }
   0xa   : > { %s28_s25 = sadd.s32 1, %s1147_s20  ;;  %s31_s26 = sadd.s32 1, %s1151_s21 }
   0xb   : > { %p29_p0 = scmp.ge.s32.totalorder %s28_s25, 2  ;;  %s40_s27 = sadd.s32 1, %s1135_s17 }
   0xc   : > { %p47_p1 = scmp.ne.s32.totalorder %s1135_s17, %s1131_s16  ;;  %p48_p2 = scmp.eq.s32.totalorder %s1155_s22, 0 }
   0xd   : > { %s1495_s25 = smov (%p29_p0, %s28_s25), 0  ;;  %s1497_s26 = smov (!%p29_p0, %s31_s26), %s1151_s21 }
   0xe   : > { %1473 = sst [smem:[#allocation10_spill]] %s1495_s25  ;;  %s36_s28 = ssub.s32 %s1147_s20, %s1495_s25 }
   0xf   : > { %p1253_p3 = por %p48_p2, %p47_p1  ;;  %p33_p4 = scmp.ge.s32.totalorder %s1497_s26, 2 }
  0x10   : > { %p53_p5 = scmp.ne.s32.totalorder %s1131_s16, %s1127_s15  ;;  %p54_p6 = scmp.eq.s32.totalorder %s784_s23, 0 }
  0x11   : > { %s108_s30 = sadd.s32 1, %s1123_s14  ;;  %s1499_s26 = smov (%p33_p4, %s1497_s26), 0 }
  0x12   : > { %1475 = sst [smem:[#allocation11_spill]] %s1499_s26  ;;  %p1261_p7 = por %p54_p6, %p53_p5 }
  0x13   : > { %p118_p8 = scmp.ne.s32.totalorder %s1123_s14, %s1119_s13  ;;  %s35_s5 = ssub.s32 %s1151_s21, %s1499_s26 }
  0x14   : > { %p119_p9 = scmp.eq.s32.totalorder %s784_s23, 3  ;;  %s37_s6 = sor.u32 %s36_s28, %s35_s5 }
  0x15   : > { %p106_p10 = scmp.eq.s32.totalorder %s35_s5, 0  ;;  %p38_p11 = scmp.eq.s32.totalorder %s37_s6, 0 }
  0x16   : > { %p1269_p12 = por %p119_p9, %p118_p8  ;;  %p124_p13 = scmp.ne.s32.totalorder %s1119_s13, %s1115_s12 }
  0x17   : > { %s1274_s8 = scalar_select %p106_p10, %s1123_s14, %s108_s30  }
  0x18   : > { %s1477_s7 = scalar_select %p1269_p12, 1, 0 }
  0x19   : > { %s1277_s9 = scalar_select %p38_p11, %s1135_s17, %s40_s27  }
  0x1a   : > { %p125_p0 = scmp.eq.s32.totalorder %s785_s24, 3  ;;  %p901_p1 = scmp.lt.s32.totalorder %s1155_s22, 4 }
  0x1b   : > { %s151_s11 = sand.u32 1, %s1135_s17   ;;  %s789_s23 = sshll.u32 %s1151_s21, 4 }
  0x1c   : > { %p1282_p2 = por %p125_p0, %p124_p13  ;;  %s788_s15 = sshll.u32 %s151_s11, 6 }
  0x1d   : > { %s160_s28 = sadd.s32 %s1147_s20, %s789_s23  ;;  %s155_s5 = scalar_lea.vmem [#allocation4], %s788_s15 }
  0x1e   : > { %s1478_s10 = scalar_select %p1282_p2, 1, 0 }
  0x1f   : > { %s163_s6 = sshll.u32 %s155_s5, 4  ;;  %s790_s26 = sshll.u32 %s160_s28, 7  ;;  %s1289_s6 = int_to_ptr.vmem [resolvable:$true] %s163_s6 }
  0x20   : > { %s1294_s27 = scalar_lea.hbm %s1466_s0, %s790_s26  ;;  %p1298_p4 = pnand %p901_p1, %p1253_p3 }
  0x21   : > { %s1302_s15 = scalar_lea.sflag [#allocation5], %s151_s11  ;;  %s1003_s23 = scalar_lea.hbm %s1294_s27, 1024 }
  0x22   : > { %p1004_p5 = scmp.ne.s32.totalorder %s1294_s27, %s1003_s23  ;;  %p1005_p6 = pneg %p1298_p4 }
  0x23   : > { %s1008_s29 = scalar_lea.hbm %s1466_s0, 4096  ;;  %p1009_p3 = scmp.lt.u32.totalorder %s1294_s27, %s1466_s0 }
  0x24   : > { %p1006_p8 = pnand %p1005_p6, %p1004_p5  ;;  %p1010_p10 = scmp.lt.u32.totalorder %s1008_s29, %s1003_s23 }
  0x25   : > { %p1012_p13 = scmp.lt.u32.totalorder %s1003_s23, %s1294_s27 }
  0x26   : > { %p1007_p9 = pneg %p1006_p8  ;;  %p1011_p11 = por %p1010_p10, %p1009_p3 }
  0x28   : > { %p1013_p0 = por %p1012_p13, %p1011_p11 }
  0x2a   : > { %p1014_p1 = pnand %p1013_p0, %p1007_p9 }
  0x2c   : > { %1017 = shalt.err (!%p1014_p1)
}
  0x2d   : > { %s1018_s11 = scalar_lea.vmem %s1289_s6, 1024  ;;  %s1157_s30 = smov [#allocation4]  }
  0x2e   : > { %p1019_p5 = scmp.ne.s32.totalorder %s1289_s6, %s1018_s11  ;;  %s1023_s25 = sshll.u32 %s1157_s30, 4  ;;  %s1024_s25 = int_to_ptr.vmem [resolvable:$false] %s1023_s25 }
  0x2f   : > { %s1025_s26 = scalar_lea.vmem %s1024_s25, 2048  ;;  %p1026_p12 = scmp.lt.s32.totalorder %s1289_s6, %s1024_s25 }
  0x30   : > { %p1021_p8 = pnand %p1019_p5, %p1005_p6  ;;  %p1027_p3 = scmp.lt.s32.totalorder %s1025_s26, %s1018_s11 }
  0x32   : > { %p1022_p2 = pneg %p1021_p8  ;;  %p1028_p10 = por %p1027_p3, %p1026_p12 }
  0x34   : > { %p1029_p11 = pnand %p1028_p10, %p1022_p2 }
  0x36   : > { %1032 = shalt.err (!%p1029_p11)
}
  0x37   : > { %s1158_s23 = smov 256   ;;  %s1159_s29 = smov 128  }
  0x38   : > { %s1160_s28 = smov 8   ;;  %p791_p6 = scmp.ge.s32.totalorder %s1155_s22, 1 }
  0x39   : > { %896 = dma.hbm_to_vmem [thread:$0]  (!%p1298_p4), %s1294_s27, 1024, %s1289_s6, %s1302_s15, %s1158_s23, %s1159_s29, %s1160_s28  }
  0x3a   : > { %p171_p9 = scmp.lt.s32.totalorder %s1155_s22, 5 }
  0x3c   : > { %p172_p13 = pnand %p791_p6, %p171_p9 }
  0x3d   : > { %s177_s5 = sand.u32 (!%p172_p13), 1, %s1131_s16  }
  0x3e   : > { %175 = sbr.rel (%p172_p13) target bundleno = 748 (0x2ec), region = 32  ;;  %s792_s11 = sshll.u32 (!%p172_p13), %s177_s5, 6 }
  0x3f   : > { %s178_s30 = scalar_lea.sflag (!%p172_p13), [#allocation5], %s177_s5  ;;  %s1333_s25 = scalar_lea.vmem (!%p172_p13), [#allocation4], %s792_s11 }
  0x45   : > { %1106 = dma.done.wait (%p1261_p7), %s178_s30, 1024  }
  0x46   : > { %1108 = vsyncadd (%p1261_p7), %s178_s30, 4294966272  ;;  %s201_s24 = sand.u32 1, %s1119_s13   ;;  %p793_p12 = scmp.ne.s32.totalorder %s1139_s18, 0 }
  0x47   : > { %s1342_s6 = scalar_lea.vmem [#allocation7], %s201_s24  ;;  %v1161_v0 = vmov (!%p793_p12), 0.0   ;;  %v1162_v1 = vmov (!%p793_p12), -3.4028235e+38  }
  0x48   : > { %206 = sbr.rel (%p793_p12) target bundleno = 80 (0x50), region = 40  ;;  %207 = vst [vmem:[#allocation2] sm:$0xff] (!%p793_p12), %v1161_v0  ;;  %208 = vst [vmem:[#allocation2 + $0x8] sm:$0xff] (!%p793_p12), %v1161_v0 }
  0x49   : > { %209 = vst [vmem:[#allocation2 + $0x10] sm:$0xff] (!%p793_p12), %v1161_v0  ;;  %210 = vst [vmem:[#allocation2 + $0x18] sm:$0xff] (!%p793_p12), %v1161_v0 }
  0x4a   : > { %211 = vst [vmem:[#allocation2 + $0x20] sm:$0xff] (!%p793_p12), %v1161_v0  ;;  %212 = vst [vmem:[#allocation2 + $0x28] sm:$0xff] (!%p793_p12), %v1161_v0 }
  0x4b   : > { %213 = vst [vmem:[#allocation2 + $0x30] sm:$0xff] (!%p793_p12), %v1161_v0  ;;  %214 = vst [vmem:[#allocation2 + $0x38] sm:$0xff] (!%p793_p12), %v1161_v0 }
  0x4c   : > { %215 = vst [vmem:[#allocation3] sm:$0xff] (!%p793_p12), %v1162_v1  ;;  %216 = vst [vmem:[#allocation3 + $0x8] sm:$0xff] (!%p793_p12), %v1162_v1 }
  0x4d   : > { %217 = vst [vmem:[#allocation3 + $0x10] sm:$0xff] (!%p793_p12), %v1162_v1  ;;  %218 = vst [vmem:[#allocation3 + $0x18] sm:$0xff] (!%p793_p12), %v1162_v1 }
  0x4e   : > { %219 = vst [vmem:[#allocation3 + $0x20] sm:$0xff] (!%p793_p12), %v1162_v1  ;;  %220 = vst [vmem:[#allocation3 + $0x28] sm:$0xff] (!%p793_p12), %v1162_v1 }
  0x4f   : > { %221 = vst [vmem:[#allocation3 + $0x30] sm:$0xff] %v1162_v1  ;;  %222 = vst [vmem:[#allocation3 + $0x38] sm:$0xff] %v1162_v1 }
  0x50 PF: > { %v223_v2 = vld [vmem:[%s1333_s25] sm:$0xff]  ;;  %v224_v4 = vld [vmem:[%s1333_s25 + $0x8] sm:$0xff]  ;;  %v225_v7 = vld [vmem:[%s1333_s25 + $0x10] sm:$0xff]  ;;  %p794_p7 = scmp.ne.s32.totalorder %s1139_s18, 1 }
  0x51   : > { %v231_v3 = vld [vmem:[#allocation2] sm:$0xff]  ;;  %v232_v6 = vld [vmem:[#allocation2 + $0x8] sm:$0xff]  ;;  %v233_v8 = vld [vmem:[#allocation2 + $0x10] sm:$0xff]  ;;  %v1163_v61 = vmov (!%p794_p7), 0.0|0.0   ;;  %vm1164_vm0 = vmmov (!%p794_p7), 0   ;;  %vm367_vm1 = vcmask (!%p794_p7), 130112  }
  0x52   : > { %v239_v5 = vadd.f32 %v231_v3, %v223_v2  ;;  %v240_v9 = vadd.f32 %v232_v6, %v224_v4  ;;  %v241_v10 = vadd.f32 %v233_v8, %v225_v7  ;;  %v226_v11 = vld [vmem:[%s1333_s25 + $0x18] sm:$0xff]  ;;  %v227_v13 = vld [vmem:[%s1333_s25 + $0x20] sm:$0xff]  ;;  %v228_v16 = vld [vmem:[%s1333_s25 + $0x28] sm:$0xff]  ;;  %865 = vmatprep.subr.bf16.mxu0 (!%p794_p7), %v1163_v61  ;;  %877 = vmatprep.subr.bf16.mxu1 (!%p794_p7), %v1163_v61  ;;  %vm374_vm2 = vcmask (!%p794_p7), 195712  }
  0x53   : > { %v234_v12 = vld [vmem:[#allocation2 + $0x18] sm:$0xff]  ;;  %v235_v15 = vld [vmem:[#allocation2 + $0x20] sm:$0xff]  ;;  %v236_v17 = vld [vmem:[#allocation2 + $0x28] sm:$0xff]  ;;  %vm381_vm3 = vcmask (!%p794_p7), 261312   ;;  %vm388_vm4 = vcmask (!%p794_p7), 326912   ;;  %vm395_vm5 = vcmask (!%p794_p7), 392512  }
  0x54   : > { %247 = vst [vmem:[#allocation2] sm:$0xff] %v239_v5  ;;  %v242_v14 = vadd.f32 %v234_v12, %v226_v11  ;;  %248 = vst [vmem:[#allocation2 + $0x8] sm:$0xff] %v240_v9  ;;  %v243_v18 = vadd.f32 %v235_v15, %v227_v13  ;;  %v244_v19 = vadd.f32 %v236_v17, %v228_v16  ;;  %v229_v20 = vld [vmem:[%s1333_s25 + $0x30] sm:$0xff]  ;;  %v230_v22 = vld [vmem:[%s1333_s25 + $0x38] sm:$0xff]  ;;  %vm402_vm6 = vcmask (!%p794_p7), 458112  }
  0x55   : > { %249 = vst [vmem:[#allocation2 + $0x10] sm:$0xff] %v241_v10  ;;  %v237_v21 = vld [vmem:[#allocation2 + $0x30] sm:$0xff]  ;;  %v238_v24 = vld [vmem:[#allocation2 + $0x38] sm:$0xff]  ;;  %v255_v25 = vld [vmem:[#allocation3] sm:$0xff]  ;;  %v356_v10 = vlaneseq (!%p794_p7)  ;;  %vm409_vm7 = vcmask (!%p794_p7), 523712   ;;  %vm411_vm8 = vcmask (!%p794_p7), 523264  }
  0x56   : > { %250 = vst [vmem:[#allocation2 + $0x18] sm:$0xff] %v242_v14  ;;  %v245_v23 = vadd.f32 %v237_v21, %v229_v20  ;;  %v256_v26 = vld [vmem:[#allocation3 + $0x8] sm:$0xff]  ;;  %251 = vst [vmem:[#allocation2 + $0x20] sm:$0xff] %v243_v18  ;;  %v246_v27 = vadd.f32 %v238_v24, %v230_v22  ;;  %v263_v28 = vmax.f32 %v255_v25, %v223_v2  ;;  %v257_v30 = vld [vmem:[#allocation3 + $0x10] sm:$0xff]  ;;  %282 = sbr.rel (%p794_p7) target bundleno = 723 (0x2d3), region = 44  ;;  %vm610_vm9 = vcmask (!%p794_p7), 1043456  }
  0x57   : > { %252 = vst [vmem:[#allocation2 + $0x28] sm:$0xff] %v244_v19  ;;  %v264_v29 = vmax.f32 %v256_v26, %v224_v4  ;;  %v258_v31 = vld [vmem:[#allocation3 + $0x18] sm:$0xff]  ;;  %v259_v32 = vld [vmem:[#allocation3 + $0x20] sm:$0xff]  ;;  %v265_v33 = vmax.f32 %v257_v30, %v225_v7  ;;  %v260_v36 = vld [vmem:[#allocation3 + $0x28] sm:$0xff]  ;;  %v1165_v7 = vmov (!%p794_p7), 0.0   ;;  %v359_v17 = vshrl.u32 (!%p794_p7), %v356_v10, 7 }
  0x58   : > { %253 = vst [vmem:[#allocation2 + $0x30] sm:$0xff] %v245_v23  ;;  %v266_v34 = vmax.f32 %v258_v31, %v226_v11  ;;  %v267_v35 = vmax.f32 %v259_v32, %v227_v13  ;;  %v261_v37 = vld [vmem:[#allocation3 + $0x30] sm:$0xff]  ;;  %v262_v38 = vld [vmem:[#allocation3 + $0x38] sm:$0xff]  ;;  %254 = vst [vmem:[#allocation2 + $0x38] sm:$0xff] %v246_v27  ;;  %v268_v39 = vmax.f32 %v260_v36, %v228_v16  ;;  %838 = vmatprep.mubr.msk.f32.mxu0 (!%p794_p7), %vm1164_vm0, %v1165_v7  ;;  %vm606_vm10 = vcmask (!%p794_p7), 31744  }
  0x59   : > { %271 = vst [vmem:[#allocation3] sm:$0xff] %v263_v28  ;;  %272 = vst [vmem:[#allocation3 + $0x8] sm:$0xff] %v264_v29  ;;  %v269_v40 = vmax.f32 %v261_v37, %v229_v20  ;;  %v270_v41 = vmax.f32 %v262_v38, %v230_v22  ;;  %v339_v58 = vld [vmem:[%s1467_s1] sm:$0xff] (!%p794_p7)  ;;  %v340_v59 = vld [vmem:[%s1467_s1 + $0x8] sm:$0xff] (!%p794_p7)  ;;  %857 = vmatprep.mubr.msk.f32.mxu1 (!%p794_p7), %vm1164_vm0, %v1165_v7  ;;  %v357_v13 = vand.u32 (!%p794_p7), 127, %v356_v10  ;;  %vm690_vm11 = vcmask (!%p794_p7), 516096  }
  0x5a   : > { %273 = vst [vmem:[#allocation3 + $0x10] sm:$0xff] %v265_v33  ;;  %274 = vst [vmem:[#allocation3 + $0x18] sm:$0xff] %v266_v34  ;;  %v866_v60 = vpack.c.bf16 (!%p794_p7), %v340_v59, %v339_v58  ;;  %v341_v62 = vld [vmem:[%s1467_s1 + $0x10] sm:$0xff] (!%p794_p7)  ;;  %v342_v63 = vld [vmem:[%s1467_s1 + $0x18] sm:$0xff] (!%p794_p7) }
  0x5b   : > { %275 = vst [vmem:[#allocation3 + $0x20] sm:$0xff] %v267_v35  ;;  %276 = vst [vmem:[#allocation3 + $0x28] sm:$0xff] %v268_v39  ;;  %v283_v43 = vld [vmem:[#allocation2] sm:$0xff] (!%p794_p7)  ;;  %v284_v45 = vld [vmem:[#allocation2 + $0x8] sm:$0xff] (!%p794_p7)  ;;  %v869_v0 = vpack.c.bf16 (!%p794_p7), %v342_v63, %v341_v62  ;;  %v362_v14 = vadd.s32 (!%p794_p7), 4294967288, %v357_v13  ;;  %v369_v20 = vadd.s32 (!%p794_p7), 4294967280, %v357_v13  ;;  %v360_v23 = vsub.s32 (!%p794_p7), %v357_v13, %v359_v17 }
  0x5c   : > { %277 = vst [vmem:[#allocation3 + $0x30] sm:$0xff] %v269_v40  ;;  %278 = vst [vmem:[#allocation3 + $0x38] sm:$0xff] %v270_v41  ;;  %v285_v42 = vld [vmem:[#allocation2 + $0x10] sm:$0xff] (!%p794_p7)  ;;  %291 = vadd.xlane.f32.xlu0 (!%p794_p7), %v283_v43  ;;  %867 = vmatpush3.bf16.msra.mxu0 (!%p794_p7), %v866_v60  ;;  %v343_v1 = vld [vmem:[%s1467_s1 + $0x20] sm:$0xff] (!%p794_p7)  ;;  %v376_v25 = vadd.s32 (!%p794_p7), 4294967272, %v357_v13  ;;  %v383_v26 = vadd.s32 (!%p794_p7), 4294967264, %v357_v13 }
  0x5d   : > { %295 = vadd.xlane.f32.xlu1 %v285_v42  ;;  %v286_v44 = vld [vmem:[#allocation2 + $0x18] sm:$0xff]  ;;  %v287_v49 = vld [vmem:[#allocation2 + $0x20] sm:$0xff]  ;;  %879 = vmatpush3.bf16.msra.mxu1 %v866_v60  ;;  %v344_v2 = vld [vmem:[%s1467_s1 + $0x28] sm:$0xff]  ;;  %v365_v18 = vsub.s32 %v362_v14, %v359_v17  ;;  %v390_v28 = vadd.s32 4294967256, %v357_v13  ;;  %v372_v29 = vsub.s32 %v369_v20, %v359_v17  ;;  %v397_v33 = vadd.s32 4294967248, %v357_v13 }
  0x5e   : > { %v288_v51 = vld [vmem:[#allocation2 + $0x28] sm:$0xff]  ;;  %868 = vmatprep.subr.bf16.mxu0 %v1163_v61  ;;  %880 = vmatprep.subr.bf16.mxu1 %v1163_v61  ;;  %v872_v3 = vpack.c.bf16 %v344_v2, %v343_v1  ;;  %v345_v4 = vld [vmem:[%s1467_s1 + $0x30] sm:$0xff]  ;;  %v346_v5 = vld [vmem:[%s1467_s1 + $0x38] sm:$0xff]  ;;  %v379_v35 = vsub.s32 %v376_v25, %v359_v17  ;;  %v386_v37 = vsub.s32 %v383_v26, %v359_v17  ;;  %v404_v42 = vadd.s32 4294967240, %v357_v13 }
  0x5f   : > { %v289_v53 = vld [vmem:[#allocation2 + $0x30] sm:$0xff]  ;;  %v290_v55 = vld [vmem:[#allocation2 + $0x38] sm:$0xff]  ;;  %v875_v6 = vpack.c.bf16 %v346_v5, %v345_v4  ;;  %v393_v40 = vsub.s32 %v390_v28, %v359_v17 }
  0x60   : > { %293 = vadd.xlane.f32.xlu0 %v284_v45  ;;  %v316_v46 = vld [vmem:[#allocation3 + $0x8] sm:$0xff]  ;;  %v315_v47 = vld [vmem:[#allocation3] sm:$0xff]  ;;  %870 = vmatpush3.bf16.msra.mxu0 %v869_v0  ;;  %v400_v45 = vsub.s32 %v397_v33, %v359_v17 }
  0x61   : > { %297 = vadd.xlane.f32.xlu1 %v286_v44  ;;  %v317_v48 = vld [vmem:[#allocation3 + $0x10] sm:$0xff]  ;;  %v318_v50 = vld [vmem:[#allocation3 + $0x18] sm:$0xff]  ;;  %882 = vmatpush3.bf16.msra.mxu1 %v869_v0 }
  0x62   : > { %v319_v52 = vld [vmem:[#allocation3 + $0x20] sm:$0xff]  ;;  %v320_v54 = vld [vmem:[#allocation3 + $0x28] sm:$0xff]  ;;  %871 = vmatprep.subr.bf16.mxu0 %v1163_v61  ;;  %883 = vmatprep.subr.bf16.mxu1 %v1163_v61 }
  0x63   : > { %v321_v56 = vld [vmem:[#allocation3 + $0x30] sm:$0xff]  ;;  %v322_v57 = vld [vmem:[#allocation3 + $0x38] sm:$0xff] }
  0x64   : > { %323 = vmax.xlane.f32.xlu0 %v315_v47  ;;  %873 = vmatpush3.bf16.msra.mxu0 %v872_v3 }
  0x65   : > { %325 = vmax.xlane.f32.xlu1 %v316_v46  ;;  %885 = vmatpush3.bf16.msra.mxu1 %v872_v3 }
  0x66   : > { %874 = vmatprep.subr.bf16.mxu0 %v1163_v61  ;;  %886 = vmatprep.subr.bf16.mxu1 %v1163_v61 }
  0x68   : > { %299 = vadd.xlane.f32.xlu0 %v287_v49  ;;  %876 = vmatpush3.bf16.msra.mxu0 %v875_v6 }
  0x69   : > { %327 = vmax.xlane.f32.xlu1 %v317_v48  ;;  %888 = vmatpush3.bf16.msra.mxu1 %v875_v6 }
  0x6a   : > { %860 = vmatprep.subr.mxu0 %v1165_v7 }
  0x6c   : > { %301 = vadd.xlane.f32.xlu0 %v288_v51 }
  0x6d   : > { %329 = vmax.xlane.f32.xlu1 %v318_v50 }
  0x70   : > { %303 = vadd.xlane.f32.xlu0 %v289_v53 }
  0x71   : > { %331 = vmax.xlane.f32.xlu1 %v319_v52 }
  0x74   : > { %305 = vadd.xlane.f32.xlu0 %v290_v55  ;;  %v407_v55 = vsub.s32 %v404_v42, %v359_v17  ;;  %v347_v17 = vld [vmem:[%s1468_s2] sm:$0xf] }
  0x75   : > { %333 = vmax.xlane.f32.xlu1 %v320_v54 }
  0x78   : > { %335 = vmax.xlane.f32.xlu0 %v321_v56 }
  0x79   : > { %337 = vmax.xlane.f32.xlu1 %v322_v57 }
  0xe9   : > { %v292_v9 = vpop.xlane.xlu0 %291 }
  0xea   : > { %v296_v8 = vpop.xlane.xlu1 %295  ;;  %v307_v24 = vmul.f32 0.00390625, %v292_v9 }
  0xeb   : > { %v309_v30 = vmul.f32 0.00390625, %v296_v8 }
  0xec   : > { %v361_v34 = vrot.slane %v307_v24, %v360_v23 }
  0xed   : > { %v294_v12 = vpop.xlane.xlu0 %293  ;;  %v373_v43 = vrot.slane %v309_v30, %v372_v29 }
  0xee   : > { %v298_v11 = vpop.xlane.xlu1 %297  ;;  %v308_v19 = vmul.f32 0.00390625, %v294_v12 }
  0xef   : > { %v310_v36 = vmul.f32 0.00390625, %v298_v11 }
  0xf0   : > { %v366_v27 = vrot.slane %v308_v19, %v365_v18 }
  0xf1   : > { %v324_v16 = vpop.xlane.xlu0 %323  ;;  %v380_v47 = vrot.slane %v310_v36, %v379_v35 }
  0xf2   : > { %v326_v15 = vpop.xlane.xlu1 %325  ;;  %v368_v39 = vsel %vm367_vm1, %v366_v27, %v361_v34  ;;  %v496_v50 = vrot.slane %v324_v16, %v360_v23 }
  0xf3   : > { %v500_v49 = vrot.slane %v326_v15, %v365_v18  ;;  %v375_v51 = vsel %vm374_vm2, %v373_v43, %v368_v39 }
  0xf4   : > { %v382_v60 = vsel %vm381_vm3, %v380_v47, %v375_v51 }
  0xf5   : > { %v300_v22 = vpop.xlane.xlu0 %299  ;;  %v501_v63 = vsel %vm367_vm1, %v500_v49, %v496_v50 }
  0xf6   : > { %v328_v21 = vpop.xlane.xlu1 %327  ;;  %v311_v38 = vmul.f32 0.00390625, %v300_v22 }
  0xf7   : > { %v505_v53 = vrot.slane %v328_v21, %v372_v29 }
  0xf8   : > { %v387_v52 = vrot.slane %v311_v38, %v386_v37 }
  0xf9   : > { %v302_v32 = vpop.xlane.xlu0 %301  ;;  %v506_v2 = vsel %vm374_vm2, %v505_v53, %v501_v63 }
  0xfa   : > { %v330_v31 = vpop.xlane.xlu1 %329  ;;  %v312_v41 = vmul.f32 0.00390625, %v302_v32  ;;  %v389_v0 = vsel %vm388_vm4, %v387_v52, %v382_v60 }
  0xfb   : > { %v510_v56 = vrot.slane %v330_v31, %v379_v35 }
  0xfc   : > { %v394_v54 = vrot.slane %v312_v41, %v393_v40 }
  0xfd   : > { %v304_v46 = vpop.xlane.xlu0 %303  ;;  %v511_v5 = vsel %vm381_vm3, %v510_v56, %v506_v2 }
  0xfe   : > { %v332_v44 = vpop.xlane.xlu1 %331  ;;  %v313_v48 = vmul.f32 0.00390625, %v304_v46  ;;  %v396_v3 = vsel %vm395_vm5, %v394_v54, %v389_v0 }
  0xff   : > { %v515_v61 = vrot.slane %v332_v44, %v386_v37 }
 0x100   : > { %v401_v57 = vrot.slane %v313_v48, %v400_v45 }
 0x101   : > { %v306_v59 = vpop.xlane.xlu0 %305  ;;  %v516_v10 = vsel %vm388_vm4, %v515_v61, %v511_v5 }
 0x102   : > { %v334_v58 = vpop.xlane.xlu1 %333  ;;  %v314_v62 = vmul.f32 0.00390625, %v306_v59  ;;  %v403_v9 = vsel %vm402_vm6, %v401_v57, %v396_v3 }
 0x103   : > { %v520_v1 = vrot.slane %v334_v58, %v393_v40 }
 0x104   : > { %v408_v4 = vrot.slane %v314_v62, %v407_v55 }
 0x105   : > { %v336_v6 = vpop.xlane.xlu0 %335  ;;  %v521_v14 = vsel %vm395_vm5, %v520_v1, %v516_v10 }
 0x106   : > { %v338_v8 = vpop.xlane.xlu1 %337  ;;  %v525_v11 = vrot.slane %v336_v6, %v400_v45  ;;  %v410_v13 = vsel %vm409_vm7, %v408_v4, %v403_v9 }
 0x107   : > { %v530_v12 = vrot.slane %v338_v8, %v407_v55  ;;  %839 = vmatmul.mubr.msk.f32.vlgmr.msra.gmra.mrb[0].mxu0 %vm411_vm8, %v410_v13 }
 0x108   : > { %v526_v15 = vsel %vm402_vm6, %v525_v11, %v521_v14  ;;  %862 = vmatprep.mubr.msk.f32.mxu0 %vm1164_vm0, %v1165_v7  ;;  %861 = vmatpush3.msk.msra.mxu0 %vm610_vm9, %v347_v17 }
 0x109   : > { %v531_v16 = vsel %vm409_vm7, %v530_v12, %v526_v15 }
 0x10a   : > { %858 = vmatmul.mubr.msk.f32.vlgmr.msra.gmra.mrb[0].mxu1 %vm411_vm8, %v531_v16 }
 0x1da   : > { %v480_v18 = vpop.f32.mrb[0].mxu0 }
 0x1db   : > { %v840_v19 = vpop.f32.mrb[1].mxu0  ;;  %v484_v21 = vmax.f32 %v480_v18, 0.0 }
 0x1dd   : > { %v600_v20 = vpop.f32.mrb[0].mxu1 }
 0x1de   : > { %v604_v22 = vmax.f32 %v600_v20, 0.0  ;;  %v859_v23 = vpop.f32.mrb[1].mxu1 }
 0x1e0   : > { %v605_v24 = vadd.f32 %v604_v22, %v484_v21 }
 0x1e2   : > { %863 = vmatmul.mubr.msk.f32.vlgmr.msra.gmra.mrb[2].mxu0 %vm606_vm10, %v605_v24 }
 0x2b5   : > { %v680_v7 = vpop.f32.mrb[2].mxu0 }
 0x2b6   : > { %v684_v25 = vsub.f32 0.0, %v680_v7  ;;  %v864_v26 = vpop.f32.mrb[3].mxu0 }
 0x2b8   : > { %v685_v27 = vmul.f32 1.442695, %v684_v25 }
 0x2ba   : > { %999 = vpow2.f32 %v685_v27 }
 0x2c4   : > { %v1000_v28 = vpop.eup %999 }
 0x2c5   : > { %v687_v29 = vadd.f32 1.0, %v1000_v28 }
 0x2c7   : > { %1001 = vrcp.f32 %v687_v29 }
 0x2d1   : > { %v1002_v30 = vpop.eup %1001 }
 0x2d2   : > { %691 = vst.msk [vmem:[%s1342_s6] sm:$0x1] %vm690_vm11, %v1002_v30 }
 0x2d3 PF: > { %s799_s29 = sshll.u32 %s1143_s19, 4  ;;  %s705_s30 = sshll.u32 %s1342_s6, 4  ;;  %s706_s30 = int_to_ptr.vmem [resolvable:$true] %s705_s30 }
 0x2d4   : > { %s1407_s11 = scalar_lea.hbm %s1469_s3, %s799_s29  ;;  %s693_s25 = scalar_lea.sflag [#allocation6], %s201_s24 }
 0x2d5   : > { %s1033_s18 = scalar_lea.vmem %s706_s30, 16  ;;  %p1480_p4 = scmp.ne.s32.totalorder %s1477_s7, 0 }
 0x2d6   : > { %p1034_p2 = scmp.ne.s32.totalorder %s706_s30, %s1033_s18  ;;  %s1166_s4 = smov [#allocation7]  }
 0x2d7   : > { %s1037_s27 = sshll.u32 %s1166_s4, 4  ;;  %s1038_s27 = int_to_ptr.vmem [resolvable:$false] %s1037_s27 }
 0x2d8   : > { %p1035_p0 = pnand %p1034_p2, %p1480_p4  ;;  %s1039_s15 = scalar_lea.vmem %s1038_s27, 32 }
 0x2d9   : > { %p1040_p5 = scmp.lt.s32.totalorder %s706_s30, %s1038_s27  ;;  %p1041_p8 = scmp.lt.s32.totalorder %s1039_s15, %s1033_s18 }
 0x2da   : > { %p1036_p1 = pneg %p1035_p0 }
 0x2db   : > { %p1042_p3 = por %p1041_p8, %p1040_p5 }
 0x2dd   : > { %p1043_p10 = pnand %p1042_p3, %p1036_p1 }
 0x2df   : > { %1046 = shalt.err (!%p1043_p10)
}
 0x2e0   : > { %s1047_s19 = scalar_lea.hbm %s1407_s11, 16  ;;  %s1051_s26 = scalar_lea.hbm %s1469_s3, 32 }
 0x2e1   : > { %p1048_p11 = scmp.ne.s32.totalorder %s1407_s11, %s1047_s19  ;;  %p1052_p13 = scmp.lt.u32.totalorder %s1407_s11, %s1469_s3 }
 0x2e2   : > { %p1053_p12 = scmp.lt.u32.totalorder %s1051_s26, %s1047_s19  ;;  %p1055_p2 = scmp.lt.u32.totalorder %s1047_s19, %s1407_s11 }
 0x2e3   : > { %p1049_p6 = pnand %p1048_p11, %p1480_p4 }
 0x2e4   : > { %p1054_p7 = por %p1053_p12, %p1052_p13 }
 0x2e5   : > { %p1050_p9 = pneg %p1049_p6 }
 0x2e6   : > { %p1056_p0 = por %p1055_p2, %p1054_p7 }
 0x2e8   : > { %p1057_p1 = pnand %p1056_p0, %p1050_p9 }
 0x2ea   : > { %1060 = shalt.err (!%p1057_p1)
}
 0x2eb   : > { %891 = dma.vmem_to_hbm [thread:$0]  (%p1480_p4), %s706_s30, 16, %s1407_s11, %s693_s25  }
 0x2ec PF: > { %p902_p5 = scmp.ge.s32.totalorder %s1155_s22, 2  ;;  %s717_s28 = sand.u32 1, %s1115_s12  }
 0x2ed   : > { %p1481_p8 = scmp.ne.s32.totalorder %s1478_s10, 0  ;;  %s718_s5 = scalar_lea.sflag [#allocation6], %s717_s28 }
 0x2ef   : > { %p898_p3 = pnand %p902_p5, %p1481_p8 }
 0x2f1   : > { %1110 = dma.done.wait (!%p898_p3), %s718_s5, 16  }
 0x2f2   : > { %1112 = vsyncadd (!%p898_p3), %s718_s5, 4294967280  ;;  %s19_s22 = sadd.s32 1, %s1155_s22   ;;  %s1482_s7 = sld [smem:[#allocation10_spill]] }
 0x2f3   : > { %p16_p10 = scmp.ge.s32.totalorder %s19_s22, 6   ;;  %s1483_s11 = sld [smem:[#allocation11_spill]] }
 0x2f4   : > { %s1484_s12 = smov %s1119_s13  ;;  %s1485_s13 = smov %s1123_s14 }
 0x2f5   : > { %s1486_s14 = smov %s1274_s8  ;;  %s1487_s15 = smov %s1131_s16 }
 0x2f6   : > { %s1488_s16 = smov %s1135_s17  ;;  %s1489_s17 = smov %s1277_s9 }
 0x2f7   : > { %s1490_s18 = smov %s1147_s20  ;;  %s1491_s19 = smov %s1151_s21 }
 0x2f8   : > { %s1492_s20 = smov %s1482_s7  ;;  %18 = sbr.rel (!%p16_p10) target bundleno = 9 (0x9), region = 85 }
 0x2f9   : > { %s1493_s21 = smov %s1483_s11 }
 0x2ff   :  { %722 = vsyncpa [#allocation5], 1 }
 0x300   :  { %724 = vsyncpa [#allocation5 + $0x1], 1 }
 0x301   :  { %725 = vsyncpa [#allocation6], 1 }
 0x302   :  { %727 = vsyncpa [#allocation6 + $0x1], 1 }

</bundles_post_ra>
